<compile_context>
chip_gen: v7x
topology: tpu7x:2x2x1
jax: 0.10.0
libtpu: 0.0.40
codegen_flags: <defaults>
</compile_context>

<pallas_src>
import functools

import jax
import jax.numpy as jnp
from jax.experimental import pallas as pl
from jax.experimental.pallas import tpu as pltpu

_SQRT_2_OVER_PI = 0.7978845608028654
_MIB = 1024 * 1024


def _round_up(x, m):
    return (x + m - 1) // m * m


def _cdiv(a, b):
    return (a + b - 1) // b


def _gelu_tanh_f32(h):
    # torch.nn.GELU(approximate='tanh'), evaluated in f32 (tanh -> EUP slot).
    return 0.5 * h * (1.0 + jnp.tanh(_SQRT_2_OVER_PI * (h + 0.044715 * h * h * h)))


def _query_vmem_capacity_bytes():
    try:
        info = pltpu.get_tpu_info()
        cap = getattr(info, "vmem_capacity_bytes", None)
        if cap:
            return int(cap)
    except Exception:
        pass
    return 64 * _MIB  # conservative fallback: v7x per-TensorCore VMEM


_VMEM_CAPACITY = _query_vmem_capacity_bytes()
# ~15% headroom for Mosaic internal scratch / spills (never pin the limit at the
# physical ceiling, esp. on 64 MiB v7x parts); 128 MiB parts get ~108 MiB.
_VMEM_BUDGET = min(int(_VMEM_CAPACITY * 0.85), 112 * _MIB)


# ----------------------------------------------------------------------------- kernels
def _mlp_kernel_resident(x_ref, w1_ref, w2_ref, o_ref):
    # Weights-resident path: full w1/w2 stay in VMEM across all row tiles
    # (constant index_map -> fetched from HBM exactly once). No hidden-axis
    # reduction, no accumulator read-modify-write.
    h = jnp.dot(x_ref[...], w1_ref[...], preferred_element_type=jnp.float32)
    g = _gelu_tanh_f32(h)
    o_ref[...] = jnp.dot(
        g.astype(w2_ref.dtype), w2_ref[...], preferred_element_type=jnp.float32
    ).astype(o_ref.dtype)


def _mlp_kernel_streamed(x_ref, w1_ref, w2_ref, o_ref, acc_ref):
    # Hidden-dim-tiled path: inner "arbitrary" k axis streams w1/w2 tiles while
    # an f32 VMEM accumulator holds the fc2 partial sums.
    k = pl.program_id(1)

    @pl.when(k == 0)
    def _():
        acc_ref[...] = jnp.zeros_like(acc_ref)

    h = jnp.dot(x_ref[...], w1_ref[...], preferred_element_type=jnp.float32)
    g = _gelu_tanh_f32(h)
    acc_ref[...] += jnp.dot(
        g.astype(w2_ref.dtype), w2_ref[...], preferred_element_type=jnp.float32
    )

    @pl.when(k == pl.num_programs(1) - 1)
    def _():
        o_ref[...] = acc_ref[...].astype(o_ref.dtype)


# ----------------------------------------------------------------------------- config
def _footprint_bytes(tm, th, in_f, out_f, x_bytes, w_bytes, resident):
    f = 2 * tm * in_f * x_bytes                     # x tile (double-buffered)
    f += 2 * tm * out_f * x_bytes                   # out tile (double-buffered)
    f += 2 * (in_f * th + th * out_f) * w_bytes     # weight tiles (2 buffers each)
    f += 2 * tm * th * 4                            # f32 fc1 intermediates (h, g)
    if not resident:
        f += tm * out_f * 4                         # f32 accumulator scratch
    return f


def _select_config(M, in_f, hid_f, out_f, x_bytes, w_bytes, th_override, tm_override):
    sublane = 8 * max(1, 4 // max(1, x_bytes))      # 8 rows f32, 16 rows bf16
    row_cap = _round_up(max(M, 1), sublane)

    tm_cands = [t for t in (1024, 512, 256, 128, 64, 32, 16, 8)
                if t % sublane == 0 and t <= row_cap]
    if row_cap <= 1024 and row_cap not in tm_cands:
        tm_cands.insert(0, row_cap)                 # exact single/few-tile option
    if not tm_cands:
        tm_cands = [row_cap]
    if tm_override is not None:
        tm_cands = [tm_override]

    th_cands = [c for c in (2048, 1024, 512, 256, 128) if hid_f % c == 0]
    if not th_cands:
        th_cands = [hid_f]
    if th_override is not None:
        th_cands = [th_override]

    def fits(tm, th, resident):
        return _footprint_bytes(tm, th, in_f, out_f, x_bytes, w_bytes,
                                resident) <= _VMEM_BUDGET

    def waste(t):
        return _cdiv(M, t) * t - M

    waste_allow = max(M // 8, 2 * sublane)

    # 1) Weights-resident, single-pass configuration (weights read from HBM once).
    if th_override is None or th_override == hid_f:
        for tm in tm_cands:
            if waste(tm) > waste_allow:
                continue
            if fits(tm, hid_f, True):
                return tm, hid_f, True

    # 2) Streaming configuration: largest row tile (arithmetic intensity w.r.t. weight
    #    streaming ~ tm FLOPs/byte) and largest hidden tile that fit the VMEM budget.
    for tm in tm_cands:
        for th in th_cands:
            if fits(tm, th, th == hid_f):
                return tm, th, th == hid_f

    # 3) Fallback: smallest candidates; let the compiler have the final word.
    return tm_cands[-1], th_cands[-1], th_cands[-1] == hid_f


# ----------------------------------------------------------------------------- wrapper
def prepare_mlp_weights(w1, w2):
    """One-time (init-time) transpose of PyTorch nn.Linear (out, in) weights to the
    row-major (in, out) layout the kernel consumes."""
    return jnp.asarray(w1).T, jnp.asarray(w2).T


@functools.partial(jax.jit, static_argnames=("tm_override", "th_override"))
def mlp_pallas(x, w1_t, w2_t, *, tm_override=None, th_override=None):
    """x: (B, S, in_f). w1_t: (in_f, hidden_f), w2_t: (hidden_f, out_f) pre-transposed."""
    B, S, in_f = x.shape
    in_f_w, hid_f = w1_t.shape
    hid_f_w, out_f = w2_t.shape
    assert in_f_w == in_f and hid_f_w == hid_f

    M = B * S
    x_bytes = jnp.dtype(x.dtype).itemsize
    w_bytes = jnp.dtype(w1_t.dtype).itemsize

    tm, th, resident = _select_config(M, in_f, hid_f, out_f, x_bytes, w_bytes,
                                      th_override, tm_override)
    if not resident:
        assert hid_f % th == 0, "hidden tile must divide hidden_features"

    num_row_tiles = _cdiv(M, tm)
    x2d = x.reshape(M, in_f)   # no padding: Pallas masks the ragged last row tile

    fp = _footprint_bytes(tm, th, in_f, out_f, x_bytes, w_bytes, resident)
    vmem_limit = int(min(max(32 * _MIB, int(1.3 * fp)), _VMEM_BUDGET))

    weight_bytes = (in_f * hid_f + hid_f * out_f) * w_bytes
    w_fetches = 1 if resident else num_row_tiles
    cost = pl.CostEstimate(
        flops=2 * num_row_tiles * tm * hid_f * (in_f + out_f),
        transcendentals=num_row_tiles * tm * hid_f,
        bytes_accessed=M * (in_f + out_f) * x_bytes + w_fetches * weight_bytes,
    )

    if resident:
        out2d = pl.pallas_call(
            _mlp_kernel_resident,
            out_shape=jax.ShapeDtypeStruct((M, out_f), x.dtype),
            grid_spec=pltpu.PrefetchScalarGridSpec(
                num_scalar_prefetch=0,
                grid=(num_row_tiles,),
                in_specs=[
                    pl.BlockSpec((tm, in_f), lambda i: (i, 0)),
                    pl.BlockSpec((in_f, hid_f), lambda i: (0, 0)),   # fetched once
                    pl.BlockSpec((hid_f, out_f), lambda i: (0, 0)),  # fetched once
                ],
                out_specs=pl.BlockSpec((tm, out_f), lambda i: (i, 0)),
            ),
            compiler_params=pltpu.CompilerParams(
                dimension_semantics=("parallel",),
                vmem_limit_bytes=vmem_limit,
            ),
            cost_estimate=cost,
        )(x2d, w1_t, w2_t)
    else:
        # TODO(synk): consider pipeline_mode=pl.Buffered(3) on the weight streams for
        # v7x if DMA remains exposed after the larger row tile (sweep on hardware).
        out2d = pl.pallas_call(
            _mlp_kernel_streamed,
            out_shape=jax.ShapeDtypeStruct((M, out_f), x.dtype),
            grid_spec=pltpu.PrefetchScalarGridSpec(
                num_scalar_prefetch=0,
                grid=(num_row_tiles, hid_f // th),
                in_specs=[
                    pl.BlockSpec((tm, in_f), lambda i, k: (i, 0)),
                    pl.BlockSpec((in_f, th), lambda i, k: (0, k)),
                    pl.BlockSpec((th, out_f), lambda i, k: (k, 0)),
                ],
                out_specs=pl.BlockSpec((tm, out_f), lambda i, k: (i, 0)),
                scratch_shapes=[pltpu.VMEM((tm, out_f), jnp.float32)],
            ),
            compiler_params=pltpu.CompilerParams(
                dimension_semantics=("parallel", "arbitrary"),
                vmem_limit_bytes=vmem_limit,
            ),
            cost_estimate=cost,
        )(x2d, w1_t, w2_t)

    return out2d.reshape(B, S, out_f)


# ----------------------------------------------------------------------------- reference
def mlp_reference(x, w1, w2):
    """Pure-JAX f32 reference matching the torch module (weights in (out, in) layout)."""
    x32 = x.astype(jnp.float32)
    h = jnp.einsum("bsd,hd->bsh", x32, w1.astype(jnp.float32),
                   precision=jax.lax.Precision.HIGHEST)
    g = _gelu_tanh_f32(h)
    return jnp.einsum("bsh,oh->bso", g, w2.astype(jnp.float32),
                      precision=jax.lax.Precision.HIGHEST)


if __name__ == "__main__":
    key = jax.random.PRNGKey(0)
    kx, k1, k2, kx2 = jax.random.split(key, 4)

    # ---- Test A: f32, lane-aligned dims -> weights-resident single-pass path.
    B, S = 2, 8
    in_f, hid_f, out_f = 128, 384, 128
    x = jax.random.normal(kx, (B, S, in_f), dtype=jnp.float32)
    w1 = jax.random.normal(k1, (hid_f, in_f), dtype=jnp.float32) * 0.05   # (out, in)
    w2 = jax.random.normal(k2, (out_f, hid_f), dtype=jnp.float32) * 0.05

    w1_t, w2_t = prepare_mlp_weights(w1, w2)
    out = jax.block_until_ready(mlp_pallas(x, w1_t, w2_t))
    ref = mlp_reference(x, w1, w2)
    assert out.shape == (B, S, out_f)
    assert jnp.allclose(out, ref, atol=2e-4, rtol=2e-4), "f32 mismatch vs reference"

    # ---- Test B: bf16 operands + ragged row count (M=18, no pad copy, masked edge tile).
    B2, S2 = 2, 9
    in2, hid2, out2 = 128, 256, 128
    xb = jax.random.normal(kx2, (B2, S2, in2), dtype=jnp.float32).astype(jnp.bfloat16)
    w1b = (jax.random.normal(k1, (hid2, in2), dtype=jnp.float32) * 0.05).astype(jnp.bfloat16)
    w2b = (jax.random.normal(k2, (out2, hid2), dtype=jnp.float32) * 0.05).astype(jnp.bfloat16)

    w1b_t, w2b_t = prepare_mlp_weights(w1b, w2b)
    outb = jax.block_until_ready(mlp_pallas(xb, w1b_t, w2b_t))
    refb = mlp_reference(xb, w1b, w2b)
    assert outb.shape == (B2, S2, out2)
    assert jnp.allclose(outb.astype(jnp.float32), refb, atol=3e-2, rtol=3e-2), (
        "bf16 mismatch vs reference"
    )

    # ---- Test C: force the hidden-tiled streaming/accumulator path (k-grid of 3).
    outc = jax.block_until_ready(mlp_pallas(x, w1_t, w2_t, th_override=128))
    assert outc.shape == (B, S, out_f)
    assert jnp.allclose(outc, ref, atol=2e-4, rtol=2e-4), "streamed-path mismatch"

    print("KERNEL_OK")
</pallas_src>

<mosaic_0001>
module attributes {stable_mosaic.version = 11 : i64} {
  func.func @_mlp_kernel_resident(%arg0: i32, %arg1: memref<16x128xf32, #tpu.memory_space<vmem>>, %arg2: memref<128x384xf32, #tpu.memory_space<vmem>>, %arg3: memref<384x128xf32, #tpu.memory_space<vmem>>, %arg4: memref<16x128xf32, #tpu.memory_space<vmem>>) attributes {dimension_semantics = [#tpu.dimension_semantics<parallel>], iteration_bounds = array<i64: 1>, scalar_prefetch = 0 : i64, scratch_operands = 0 : i64, tpu.core_type = #tpu.core_type<tc>, window_params = [{transform_indices = @transform_0, window_bounds = array<i64: 16, 128>}, {pipeline_mode = #tpu.pipeline_mode<synchronous>, transform_indices = @transform_1, window_bounds = array<i64: 128, 384>}, {pipeline_mode = #tpu.pipeline_mode<synchronous>, transform_indices = @transform_2, window_bounds = array<i64: 384, 128>}, {transform_indices = @transform_3, window_bounds = array<i64: 16, 128>}]} {
    %c0 = arith.constant 0 : index
    %c0_0 = arith.constant 0 : index
    %0 = vector.load %arg1[%c0, %c0_0] : memref<16x128xf32, #tpu.memory_space<vmem>>, vector<16x128xf32>
    %c0_1 = arith.constant 0 : index
    %c0_2 = arith.constant 0 : index
    %1 = vector.load %arg2[%c0_1, %c0_2] : memref<128x384xf32, #tpu.memory_space<vmem>>, vector<128x384xf32>
    %cst = arith.constant dense<0.000000e+00> : vector<16x384xf32>
    %2 = tpu.matmul %0, %1, %cst {dimension_numbers = #tpu.dot_dimension_numbers<[1], [0], [0], [1], [0, 0, 1, 1], [], []>} : vector<16x128xf32>, vector<128x384xf32>, vector<16x384xf32> -> vector<16x384xf32>
    %cst_3 = arith.constant 5.000000e-01 : f32
    %3 = vector.broadcast %cst_3 : f32 to vector<16x384xf32>
    %4 = arith.mulf %3, %2 : vector<16x384xf32>
    %cst_4 = arith.constant 4.471500e-02 : f32
    %5 = vector.broadcast %cst_4 : f32 to vector<16x384xf32>
    %6 = arith.mulf %5, %2 : vector<16x384xf32>
    %7 = arith.mulf %6, %2 : vector<16x384xf32>
    %8 = arith.mulf %7, %2 : vector<16x384xf32>
    %9 = arith.addf %2, %8 : vector<16x384xf32>
    %cst_5 = arith.constant 0.797884583 : f32
    %10 = vector.broadcast %cst_5 : f32 to vector<16x384xf32>
    %11 = arith.mulf %10, %9 : vector<16x384xf32>
    %12 = math.tanh %11 : vector<16x384xf32>
    %cst_6 = arith.constant 1.000000e+00 : f32
    %13 = vector.broadcast %cst_6 : f32 to vector<16x384xf32>
    %14 = arith.addf %13, %12 : vector<16x384xf32>
    %15 = arith.mulf %4, %14 : vector<16x384xf32>
    %c0_7 = arith.constant 0 : index
    %c0_8 = arith.constant 0 : index
    %16 = vector.load %arg3[%c0_7, %c0_8] : memref<384x128xf32, #tpu.memory_space<vmem>>, vector<384x128xf32>
    %cst_9 = arith.constant dense<0.000000e+00> : vector<16x128xf32>
    %17 = tpu.matmul %15, %16, %cst_9 {dimension_numbers = #tpu.dot_dimension_numbers<[1], [0], [0], [1], [0, 0, 1, 1], [], []>} : vector<16x384xf32>, vector<384x128xf32>, vector<16x128xf32> -> vector<16x128xf32>
    %c0_10 = arith.constant 0 : index
    %c0_11 = arith.constant 0 : index
    %18 = vector.load %arg4[%c0_10, %c0_11] : memref<16x128xf32, #tpu.memory_space<vmem>>, vector<16x128xf32>
    tpu.vector_store %arg4[%c0_10, %c0_11], %17 {strides = array<i32>} : memref<16x128xf32, #tpu.memory_space<vmem>>, vector<16x128xf32>,
    return
  }
  func.func @transform_0(%arg0: i32) -> (i32, i32) {
    %c0_i32 = arith.constant 0 : i32
    %c0_i32_0 = arith.constant 0 : i32
    return %arg0, %c0_i32 : i32, i32
  }
  func.func @transform_1(%arg0: i32) -> (i32, i32) {
    %c0_i32 = arith.constant 0 : i32
    %c0_i32_0 = arith.constant 0 : i32
    %c0_i32_1 = arith.constant 0 : i32
    return %c0_i32, %c0_i32_0 : i32, i32
  }
  func.func @transform_2(%arg0: i32) -> (i32, i32) {
    %c0_i32 = arith.constant 0 : i32
    %c0_i32_0 = arith.constant 0 : i32
    %c0_i32_1 = arith.constant 0 : i32
    return %c0_i32, %c0_i32_0 : i32, i32
  }
  func.func @transform_3(%arg0: i32) -> (i32, i32) {
    %c0_i32 = arith.constant 0 : i32
    %c0_i32_0 = arith.constant 0 : i32
    return %arg0, %c0_i32 : i32, i32
  }
}

</mosaic_0001>

<bundles_post_ra>
// kernel: mlp_pallas.1
= control target key start
LH: loop header
LB: loop body
LE: loop exit
PB: predicated region body
PF: predicated region fallthrough
CT: control target
= control target key end

     0   :  { %8 = vsyncpa [#allocation3], 0  ;;  %s1005_s0 = inlined_call_operand.hbm [shape: f32[16,128], index: 0, kind: input, shape index: {}]   ;;  %s1006_s1 = inlined_call_operand.hbm [shape: f32[128,384], index: 1, kind: input, shape index: {}]   ;;  %s1007_s2 = inlined_call_operand.hbm [shape: f32[384,128], index: 2, kind: input, shape index: {}]   ;;  %s1008_s3 = inlined_call_operand.hbm [shape: f32[16,128], index: 3, kind: output, shape index: {}]  }
   0x1   :  { %9 = vsyncpa [#allocation6], 0 }
   0x2   :  { %10 = vsyncpa [#allocation4], 0  ;;  %s917_s12 = smov [#allocation5]   ;;  %s823_s16 = scalar_lea.hbm %s1006_s1, 6144 }
   0x3   :  { %s28_s13 = sshll.u32 %s917_s12, 4  ;;  %p824_p0 = scmp.ne.s32.totalorder %s1006_s1, %s823_s16  ;;  %s29_s13 = int_to_ptr.vmem [resolvable:$true] %s28_s13 }
   0x4   :  { %p827_p1 = scmp.lt.u32.totalorder %s823_s16, %s1006_s1 }
   0x6   :  { %p829_p2 = pnand %p827_p1, %p824_p0 }
   0x8   :  { %832 = shalt.err (!%p829_p2)
}
   0x9   :  { %s833_s21 = scalar_lea.vmem %s29_s13, 6144  ;;  %p838_p4 = scmp.lt.s32.totalorder %s29_s13, %s29_s13 }
   0xa   :  { %p834_p3 = scmp.ne.s32.totalorder %s29_s13, %s833_s21  ;;  %p839_p5 = scmp.lt.s32.totalorder %s833_s21, %s833_s21 }
   0xc   :  { %p840_p6 = por %p839_p5, %p838_p4 }
   0xe   :  { %p841_p7 = pnand %p840_p6, %p834_p3 }
  0x10   :  { %844 = shalt.err (!%p841_p7)
}
  0x11   :  { %s918_s22 = smov 384   ;;  %s919_s23 = smov 24  }
  0x12   :  { %34 = dma.hbm_to_vmem [thread:$0]  %s1006_s1, 6144, %s29_s13, [#allocation6], %s918_s22, %s918_s22, %s919_s23  }
  0x13   :  { %s920_s26 = smov [#allocation2]   ;;  %s845_s30 = scalar_lea.hbm %s1005_s0, 256 }
  0x14   :  { %s16_s27 = sshll.u32 %s920_s26, 4  ;;  %p846_p8 = scmp.ne.s32.totalorder %s1005_s0, %s845_s30  ;;  %s17_s27 = int_to_ptr.vmem [resolvable:$true] %s16_s27 }
  0x15   :  { %p849_p9 = scmp.lt.u32.totalorder %s845_s30, %s1005_s0 }
  0x17   :  { %p851_p10 = pnand %p849_p9, %p846_p8 }
  0x19   :  { %854 = shalt.err (!%p851_p10)
}
  0x1a   :  { %s855_s8 = scalar_lea.vmem %s17_s27, 256  ;;  %p860_p12 = scmp.lt.s32.totalorder %s17_s27, %s17_s27 }
  0x1b   :  { %p856_p11 = scmp.ne.s32.totalorder %s17_s27, %s855_s8  ;;  %p861_p13 = scmp.lt.s32.totalorder %s855_s8, %s855_s8 }
  0x1d   :  { %p862_p0 = por %p861_p13, %p860_p12 }
  0x1f   :  { %p863_p1 = pnand %p862_p0, %p856_p11 }
  0x21   :  { %866 = shalt.err (!%p863_p1)
}
  0x22   :  { %s921_s1 = smov 128   ;;  %s922_s9 = smov 8  }
  0x23   :  { %22 = dma.hbm_to_vmem [thread:$0]  %s1005_s0, 256, %s17_s27, [#allocation3], %s921_s1, %s921_s1, %s922_s9  }
  0x24   :  { %s923_s12 = smov [#allocation7]   ;;  %s867_s16 = scalar_lea.hbm %s1007_s2, 6144 }
  0x25   :  { %s40_s13 = sshll.u32 %s923_s12, 4  ;;  %p868_p2 = scmp.ne.s32.totalorder %s1007_s2, %s867_s16  ;;  %s41_s13 = int_to_ptr.vmem [resolvable:$true] %s40_s13 }
  0x26   :  { %p871_p3 = scmp.lt.u32.totalorder %s867_s16, %s1007_s2 }
  0x28   :  { %p873_p4 = pnand %p871_p3, %p868_p2 }
  0x2a   :  { %876 = shalt.err (!%p873_p4)
}
  0x2b   :  { %s877_s21 = scalar_lea.vmem %s41_s13, 6144  ;;  %p882_p6 = scmp.lt.s32.totalorder %s41_s13, %s41_s13 }
  0x2c   :  { %p878_p5 = scmp.ne.s32.totalorder %s41_s13, %s877_s21  ;;  %p883_p7 = scmp.lt.s32.totalorder %s877_s21, %s877_s21 }
  0x2e   :  { %p884_p8 = por %p883_p7, %p882_p6 }
  0x30   :  { %p885_p9 = pnand %p884_p8, %p878_p5 }
  0x32   :  { %888 = shalt.err (!%p885_p9)
}
  0x33   :  { %46 = dma.hbm_to_vmem [thread:$0]  %s1007_s2, 6144, %s41_s13, [#allocation6], %s921_s1, %s921_s1, %s922_s9  }
  0x34   :  { %911 = dma.done.wait [#allocation3], 256  }
  0x35   :  { %912 = vsyncadd [#allocation3], 4294967040 }
  0x36   :  { %913 = dma.done.wait [#allocation6], 12288  }
  0x37   :  { %914 = vsyncadd [#allocation6], 4294955008  ;;  %v924_v0 = vmov 0.0   ;;  %v59_v1 = vld [vmem:[#allocation5 + $0x8] sm:$0xff]  ;;  %v62_v2 = vld [vmem:[#allocation5 + $0x20] sm:$0xff]  ;;  %s925_s2 = smov [#allocation8]  }
  0x38   :  { %170 = vmatprep.mubr.f32.mxu0 %v924_v0  ;;  %v60_v3 = vld [vmem:[#allocation5 + $0x10] sm:$0xff]  ;;  %v674_v4 = vpack.c.bf16 %v62_v2, %v59_v1  ;;  %v63_v5 = vld [vmem:[#allocation5 + $0x28] sm:$0xff]  ;;  %v58_v6 = vld [vmem:[#allocation5] sm:$0xff]  ;;  %s517_s23 = sshll.u32 %s925_s2, 4  ;;  %s518_s23 = int_to_ptr.vmem [resolvable:$true] %s517_s23 }
  0x39   :  { %v61_v7 = vld [vmem:[#allocation5 + $0x18] sm:$0xff]  ;;  %v706_v8 = vpack.c.bf16 %v63_v5, %v60_v3  ;;  %v68_v11 = vld [vmem:[#allocation5 + $0x50] sm:$0xff]  ;;  %v66_v12 = vld [vmem:[#allocation5 + $0x40] sm:$0xff]  ;;  %s889_s24 = scalar_lea.vmem %s518_s23, 256  ;;  %p894_p11 = scmp.lt.s32.totalorder %s518_s23, %s518_s23 }
  0x3a   :  { %v676_v9 = vpack.c.bf16 %v61_v7, %v58_v6  ;;  %v65_v10 = vld [vmem:[#allocation5 + $0x38] sm:$0xff]  ;;  %675 = vmatprep.subr.bf16.mxu0 %v674_v4  ;;  %v64_v15 = vld [vmem:[#allocation5 + $0x30] sm:$0xff]  ;;  %v67_v16 = vld [vmem:[#allocation5 + $0x48] sm:$0xff]  ;;  %p890_p10 = scmp.ne.s32.totalorder %s518_s23, %s889_s24  ;;  %p895_p12 = scmp.lt.s32.totalorder %s889_s24, %s889_s24 }
  0x3b   :  { %v678_v13 = vpack.c.bf16 %v68_v11, %v65_v10  ;;  %v69_v14 = vld [vmem:[#allocation5 + $0x58] sm:$0xff]  ;;  %707 = vmatprep.subr.bf16.mxu1 %v706_v8  ;;  %v680_v18 = vpack.c.bf16 %v67_v16, %v64_v15  ;;  %v71_v19 = vld [vmem:[#allocation5 + $0x68] sm:$0xff]  ;;  %v74_v20 = vld [vmem:[#allocation5 + $0x80] sm:$0xff] }
  0x3c   :  { %677 = vmatpush1.bf16.msra.mxu0 %v676_v9  ;;  %v710_v17 = vpack.c.bf16 %v69_v14, %v66_v12  ;;  %v72_v21 = vld [vmem:[#allocation5 + $0x70] sm:$0xff]  ;;  %709 = vmatpush3.bf16.msra.mxu1 %v706_v8  ;;  %v682_v22 = vpack.c.bf16 %v74_v20, %v71_v19  ;;  %v75_v23 = vld [vmem:[#allocation5 + $0x88] sm:$0xff]  ;;  %v70_v24 = vld [vmem:[#allocation5 + $0x60] sm:$0xff]  ;;  %p896_p13 = por %p895_p12, %p894_p11 }
  0x3d   :  { %679 = vmatprep.subr.bf16.mxu0 %v678_v13  ;;  %v73_v25 = vld [vmem:[#allocation5 + $0x78] sm:$0xff]  ;;  %v714_v26 = vpack.c.bf16 %v75_v23, %v72_v21  ;;  %v80_v28 = vld [vmem:[#allocation5 + $0xb0] sm:$0xff]  ;;  %v78_v29 = vld [vmem:[#allocation5 + $0xa0] sm:$0xff] }
  0x3e   :  { %711 = vmatprep.subr.bf16.mxu1 %v710_v17  ;;  %v77_v27 = vld [vmem:[#allocation5 + $0x98] sm:$0xff]  ;;  %v684_v31 = vpack.c.bf16 %v73_v25, %v70_v24  ;;  %v76_v33 = vld [vmem:[#allocation5 + $0x90] sm:$0xff]  ;;  %v79_v34 = vld [vmem:[#allocation5 + $0xa8] sm:$0xff]  ;;  %p897_p0 = pnand %p896_p13, %p890_p10 }
  0x3f   :  { %v81_v30 = vld [vmem:[#allocation5 + $0xb8] sm:$0xff]  ;;  %v686_v32 = vpack.c.bf16 %v80_v28, %v77_v27  ;;  %v83_v36 = vld [vmem:[#allocation5 + $0xc8] sm:$0xff]  ;;  %v86_v37 = vld [vmem:[#allocation5 + $0xe0] sm:$0xff]  ;;  %v688_v40 = vpack.c.bf16 %v79_v34, %v76_v33 }
  0x40   :  { %681 = vmatpush1.bf16.msra.mxu0 %v680_v18  ;;  %713 = vmatpush3.bf16.msra.mxu1 %v710_v17  ;;  %v718_v35 = vpack.c.bf16 %v81_v30, %v78_v29  ;;  %v84_v38 = vld [vmem:[#allocation5 + $0xd0] sm:$0xff]  ;;  %v87_v39 = vld [vmem:[#allocation5 + $0xe8] sm:$0xff]  ;;  %v690_v41 = vpack.c.bf16 %v86_v37, %v83_v36  ;;  %v82_v42 = vld [vmem:[#allocation5 + $0xc0] sm:$0xff] }
  0x41   :  { %683 = vmatprep.subr.bf16.mxu0 %v682_v22  ;;  %715 = vmatprep.subr.bf16.mxu1 %v714_v26  ;;  %v85_v43 = vld [vmem:[#allocation5 + $0xd8] sm:$0xff]  ;;  %v722_v44 = vpack.c.bf16 %v87_v39, %v84_v38  ;;  %v92_v46 = vld [vmem:[#allocation5 + $0x110] sm:$0xff]  ;;  %v90_v47 = vld [vmem:[#allocation5 + $0x100] sm:$0xff] }
  0x42   :  { %v89_v45 = vld [vmem:[#allocation5 + $0xf8] sm:$0xff]  ;;  %v692_v49 = vpack.c.bf16 %v85_v43, %v82_v42  ;;  %v56_v50 = vld [vmem:[#allocation2] sm:$0xff]  ;;  %v91_v53 = vld [vmem:[#allocation5 + $0x108] sm:$0xff] }
  0x43   :  { %v93_v48 = vld [vmem:[#allocation5 + $0x118] sm:$0xff]  ;;  %v694_v51 = vpack.c.bf16 %v92_v46, %v89_v45  ;;  %v88_v52 = vld [vmem:[#allocation5 + $0xf0] sm:$0xff]  ;;  %v95_v55 = vld [vmem:[#allocation5 + $0x128] sm:$0xff]  ;;  %636 = vmatprep.mubr.f32.mxu1 %v56_v50 }
  0x44   :  { %685 = vmatpush1.bf16.msra.mxu0 %v684_v31  ;;  %717 = vmatpush3.bf16.msra.mxu1 %v714_v26  ;;  %v726_v54 = vpack.c.bf16 %v93_v48, %v90_v47  ;;  %v98_v56 = vld [vmem:[#allocation5 + $0x140] sm:$0xff]  ;;  %v96_v57 = vld [vmem:[#allocation5 + $0x130] sm:$0xff]  ;;  %v99_v58 = vld [vmem:[#allocation5 + $0x148] sm:$0xff]  ;;  %v696_v59 = vpack.c.bf16 %v91_v53, %v88_v52 }
  0x45   :  { %687 = vmatprep.subr.bf16.mxu0 %v686_v32  ;;  %719 = vmatprep.subr.bf16.mxu1 %v718_v35  ;;  %v698_v60 = vpack.c.bf16 %v98_v56, %v95_v55  ;;  %v94_v61 = vld [vmem:[#allocation5 + $0x120] sm:$0xff]  ;;  %v97_v62 = vld [vmem:[#allocation5 + $0x138] sm:$0xff]  ;;  %v730_v63 = vpack.c.bf16 %v99_v58, %v96_v57  ;;  %v104_v2 = vld [vmem:[#allocation5 + $0x170] sm:$0xff] }
  0x46   :  { %v101_v1 = vld [vmem:[#allocation5 + $0x158] sm:$0xff]  ;;  %v102_v3 = vld [vmem:[#allocation5 + $0x160] sm:$0xff]  ;;  %v700_v5 = vpack.c.bf16 %v97_v62, %v94_v61  ;;  %v100_v7 = vld [vmem:[#allocation5 + $0x150] sm:$0xff] }
  0x47   :  { %v105_v4 = vld [vmem:[#allocation5 + $0x178] sm:$0xff]  ;;  %v702_v6 = vpack.c.bf16 %v104_v2, %v101_v1  ;;  %v103_v8 = vld [vmem:[#allocation5 + $0x168] sm:$0xff]  ;;  %v328_v10 = vld [vmem:[#allocation7 + $0x80] sm:$0xff] }
  0x48   :  { %689 = vmatpush1.bf16.msra.mxu0 %v688_v40  ;;  %721 = vmatpush3.bf16.msra.mxu1 %v718_v35  ;;  %v734_v9 = vpack.c.bf16 %v105_v4, %v102_v3  ;;  %v329_v11 = vld [vmem:[#allocation7 + $0x88] sm:$0xff]  ;;  %v344_v12 = vld [vmem:[#allocation7 + $0x100] sm:$0xff]  ;;  %v704_v14 = vpack.c.bf16 %v103_v8, %v100_v7  ;;  %v57_v19 = vld [vmem:[#allocation2 + $0x8] sm:$0xff] }
  0x49   :  { %691 = vmatprep.subr.bf16.mxu0 %v690_v41  ;;  %723 = vmatprep.subr.bf16.mxu1 %v722_v44  ;;  %v345_v13 = vld [vmem:[#allocation7 + $0x108] sm:$0xff]  ;;  %v738_v15 = vpack.c.bf16 %v329_v11, %v328_v10  ;;  %v312_v17 = vld [vmem:[#allocation7] sm:$0xff]  ;;  %v330_v21 = vld [vmem:[#allocation7 + $0x90] sm:$0xff] }
  0x4a   :  { %v770_v16 = vpack.c.bf16 %v345_v13, %v344_v12  ;;  %v313_v18 = vld [vmem:[#allocation7 + $0x8] sm:$0xff]  ;;  %v331_v22 = vld [vmem:[#allocation7 + $0x98] sm:$0xff]  ;;  %v346_v23 = vld [vmem:[#allocation7 + $0x110] sm:$0xff] }
  0x4b   :  { %v740_v20 = vpack.c.bf16 %v313_v18, %v312_v17  ;;  %v742_v24 = vpack.c.bf16 %v331_v22, %v330_v21  ;;  %v347_v25 = vld [vmem:[#allocation7 + $0x118] sm:$0xff]  ;;  %v314_v26 = vld [vmem:[#allocation7 + $0x10] sm:$0xff]  ;;  %v332_v30 = vld [vmem:[#allocation7 + $0xa0] sm:$0xff] }
  0x4c   :  { %693 = vmatpush1.bf16.msra.mxu0 %v692_v49  ;;  %725 = vmatpush3.bf16.msra.mxu1 %v722_v44  ;;  %v315_v27 = vld [vmem:[#allocation7 + $0x18] sm:$0xff]  ;;  %v774_v28 = vpack.c.bf16 %v347_v25, %v346_v23  ;;  %v333_v31 = vld [vmem:[#allocation7 + $0xa8] sm:$0xff]  ;;  %v348_v32 = vld [vmem:[#allocation7 + $0x120] sm:$0xff] }
  0x4d   :  { %695 = vmatprep.subr.bf16.mxu0 %v694_v51  ;;  %727 = vmatprep.subr.bf16.mxu1 %v726_v54  ;;  %v744_v29 = vpack.c.bf16 %v315_v27, %v314_v26  ;;  %v349_v33 = vld [vmem:[#allocation7 + $0x128] sm:$0xff]  ;;  %v316_v34 = vld [vmem:[#allocation7 + $0x20] sm:$0xff]  ;;  %v334_v38 = vld [vmem:[#allocation7 + $0xb0] sm:$0xff] }
  0x4e   :  { %v317_v35 = vld [vmem:[#allocation7 + $0x28] sm:$0xff]  ;;  %v778_v36 = vpack.c.bf16 %v349_v33, %v348_v32  ;;  %v335_v39 = vld [vmem:[#allocation7 + $0xb8] sm:$0xff]  ;;  %v350_v40 = vld [vmem:[#allocation7 + $0x130] sm:$0xff] }
  0x4f   :  { %v748_v37 = vpack.c.bf16 %v317_v35, %v316_v34  ;;  %v750_v41 = vpack.c.bf16 %v335_v39, %v334_v38  ;;  %v351_v42 = vld [vmem:[#allocation7 + $0x138] sm:$0xff]  ;;  %v318_v43 = vld [vmem:[#allocation7 + $0x30] sm:$0xff]  ;;  %v336_v47 = vld [vmem:[#allocation7 + $0xc0] sm:$0xff] }
  0x50   :  { %697 = vmatpush1.bf16.msra.mxu0 %v696_v59  ;;  %729 = vmatpush3.bf16.msra.mxu1 %v726_v54  ;;  %v319_v44 = vld [vmem:[#allocation7 + $0x38] sm:$0xff]  ;;  %v782_v45 = vpack.c.bf16 %v351_v42, %v350_v40  ;;  %v337_v48 = vld [vmem:[#allocation7 + $0xc8] sm:$0xff]  ;;  %v352_v49 = vld [vmem:[#allocation7 + $0x140] sm:$0xff] }
  0x51   :  { %699 = vmatprep.subr.bf16.mxu0 %v698_v60  ;;  %731 = vmatprep.subr.bf16.mxu1 %v730_v63  ;;  %v752_v46 = vpack.c.bf16 %v319_v44, %v318_v43  ;;  %v353_v51 = vld [vmem:[#allocation7 + $0x148] sm:$0xff]  ;;  %v320_v52 = vld [vmem:[#allocation7 + $0x40] sm:$0xff]  ;;  %v338_v56 = vld [vmem:[#allocation7 + $0xd0] sm:$0xff] }
  0x52   :  { %v321_v53 = vld [vmem:[#allocation7 + $0x48] sm:$0xff]  ;;  %v786_v54 = vpack.c.bf16 %v353_v51, %v352_v49  ;;  %v339_v57 = vld [vmem:[#allocation7 + $0xd8] sm:$0xff]  ;;  %v354_v58 = vld [vmem:[#allocation7 + $0x150] sm:$0xff] }
  0x53   :  { %v756_v55 = vpack.c.bf16 %v321_v53, %v320_v52  ;;  %v758_v59 = vpack.c.bf16 %v339_v57, %v338_v56  ;;  %v355_v60 = vld [vmem:[#allocation7 + $0x158] sm:$0xff]  ;;  %v322_v61 = vld [vmem:[#allocation7 + $0x50] sm:$0xff]  ;;  %v340_v2 = vld [vmem:[#allocation7 + $0xe0] sm:$0xff] }
  0x54   :  { %701 = vmatpush1.bf16.msra.mxu0 %v700_v5  ;;  %733 = vmatpush3.bf16.msra.mxu1 %v730_v63  ;;  %v323_v62 = vld [vmem:[#allocation7 + $0x58] sm:$0xff]  ;;  %v790_v63 = vpack.c.bf16 %v355_v60, %v354_v58  ;;  %v341_v3 = vld [vmem:[#allocation7 + $0xe8] sm:$0xff]  ;;  %v356_v4 = vld [vmem:[#allocation7 + $0x160] sm:$0xff] }
  0x55   :  { %703 = vmatprep.subr.bf16.mxu0 %v702_v6  ;;  %735 = vmatprep.subr.bf16.mxu1 %v734_v9  ;;  %v760_v1 = vpack.c.bf16 %v323_v62, %v322_v61  ;;  %v762_v5 = vpack.c.bf16 %v341_v3, %v340_v2  ;;  %v357_v6 = vld [vmem:[#allocation7 + $0x168] sm:$0xff]  ;;  %v324_v7 = vld [vmem:[#allocation7 + $0x60] sm:$0xff]  ;;  %v342_v11 = vld [vmem:[#allocation7 + $0xf0] sm:$0xff] }
  0x56   :  { %v325_v8 = vld [vmem:[#allocation7 + $0x68] sm:$0xff]  ;;  %v343_v12 = vld [vmem:[#allocation7 + $0xf8] sm:$0xff]  ;;  %v358_v13 = vld [vmem:[#allocation7 + $0x170] sm:$0xff] }
  0x57   :  { %v764_v10 = vpack.c.bf16 %v325_v8, %v324_v7  ;;  %v327_v17 = vld [vmem:[#allocation7 + $0x78] sm:$0xff] }
  0x58   :  { %705 = vmatpush1.bf16.msra.mxu0 %v704_v14  ;;  %737 = vmatpush3.bf16.msra.mxu1 %v734_v9  ;;  %v794_v9 = vpack.c.bf16 %v357_v6, %v356_v4  ;;  %v766_v14 = vpack.c.bf16 %v343_v12, %v342_v11 }
  0x59   :  { %739 = vmatprep.subr.bf16.mxu0 %v738_v15  ;;  %771 = vmatprep.subr.bf16.mxu1 %v770_v16  ;;  %v359_v15 = vld [vmem:[#allocation7 + $0x178] sm:$0xff] }
  0x5a   :  { %v798_v18 = vpack.c.bf16 %v359_v15, %v358_v13 }
  0x5b   :  { %171 = vmatmul.mubr.f32.vlgmr.msra.gmra.mrb[0].mxu0 %v56_v50  ;;  %637 = vmatmul.mubr.f32.vlgmr.msra.gmra.mrb[0].mxu1 %v57_v19  ;;  %v754_v50 = vpack.c.bf16 %v337_v48, %v336_v47 }
  0x5c   :  { %176 = vmatprep.mubr.f32.mxu0 %v924_v0  ;;  %741 = vmatpush3.bf16.msra.mxu0 %v740_v20  ;;  %v746_v0 = vpack.c.bf16 %v333_v31, %v332_v30 }
  0x5d   :  { %773 = vmatpush3.bf16.msra.mxu1 %v770_v16  ;;  %743 = vmatprep.subr.bf16.mxu0 %v742_v24  ;;  %v326_v16 = vld [vmem:[#allocation7 + $0x70] sm:$0xff] }
  0x5e   :  { %775 = vmatprep.subr.bf16.mxu1 %v774_v28 }
  0x5f   :  { %177 = vmatmul.mubr.f32.gmra.mrb[2].mxu0 %v57_v19  ;;  %v768_v19 = vpack.c.bf16 %v327_v17, %v326_v16 }
  0x60   :  { %745 = vmatpush3.bf16.msra.mxu0 %v744_v29 }
  0x61   :  { %777 = vmatpush3.bf16.msra.mxu1 %v774_v28  ;;  %747 = vmatprep.subr.bf16.mxu0 %v746_v0 }
  0x62   :  { %779 = vmatprep.subr.bf16.mxu1 %v778_v36 }
  0x64   :  { %749 = vmatpush3.bf16.msra.mxu0 %v748_v37 }
  0x65   :  { %781 = vmatpush3.bf16.msra.mxu1 %v778_v36  ;;  %751 = vmatprep.subr.bf16.mxu0 %v750_v41 }
  0x66   :  { %783 = vmatprep.subr.bf16.mxu1 %v782_v45 }
  0x68   :  { %753 = vmatpush3.bf16.msra.mxu0 %v752_v46 }
  0x69   :  { %785 = vmatpush3.bf16.msra.mxu1 %v782_v45  ;;  %755 = vmatprep.subr.bf16.mxu0 %v754_v50 }
  0x6a   :  { %787 = vmatprep.subr.bf16.mxu1 %v786_v54 }
  0x6c   :  { %757 = vmatpush3.bf16.msra.mxu0 %v756_v55 }
  0x6d   :  { %789 = vmatpush3.bf16.msra.mxu1 %v786_v54  ;;  %759 = vmatprep.subr.bf16.mxu0 %v758_v59 }
  0x6e   :  { %791 = vmatprep.subr.bf16.mxu1 %v790_v63 }
  0x70   :  { %761 = vmatpush3.bf16.msra.mxu0 %v760_v1 }
  0x71   :  { %793 = vmatpush3.bf16.msra.mxu1 %v790_v63  ;;  %763 = vmatprep.subr.bf16.mxu0 %v762_v5 }
  0x72   :  { %795 = vmatprep.subr.bf16.mxu1 %v794_v9 }
  0x74   :  { %765 = vmatpush3.bf16.msra.mxu0 %v764_v10 }
  0x75   :  { %797 = vmatpush3.bf16.msra.mxu1 %v794_v9  ;;  %767 = vmatprep.subr.bf16.mxu0 %v766_v14 }
  0x76   :  { %799 = vmatprep.subr.bf16.mxu1 %v798_v18 }
  0x78   :  { %769 = vmatpush3.bf16.msra.mxu0 %v768_v19 }
  0x79   :  { %801 = vmatpush3.bf16.msra.mxu1 %v798_v18 }
 0x12e   :  { %v172_v20 = vpop.f32.mrb[0].mxu0  ;;  %v638_v22 = vpop.f32.mrb[0].mxu1 }
 0x12f   :  { %v264_v21 = vmul.f32 0.044715, %v172_v20  ;;  %v174_v23 = vpop.f32.mrb[1].mxu0  ;;  %v269_v24 = vmul.f32 0.044715, %v638_v22  ;;  %v249_v26 = vpop.f32.mrb[1].mxu1 }
 0x130   :  { %v265_v25 = vmul.f32 0.044715, %v174_v23  ;;  %v266_v28 = vmul.f32 0.044715, %v249_v26  ;;  %v259_v60 = vmul.f32 0.5, %v174_v23  ;;  %v258_v1 = vmul.f32 0.5, %v172_v20 }
 0x131   :  { %v270_v27 = vmul.f32 %v264_v21, %v172_v20  ;;  %v275_v29 = vmul.f32 %v638_v22, %v269_v24  ;;  %v260_v2 = vmul.f32 0.5, %v249_v26  ;;  %v263_v5 = vmul.f32 0.5, %v638_v22 }
 0x132   :  { %v271_v30 = vmul.f32 %v265_v25, %v174_v23  ;;  %v178_v31 = vpop.f32.mrb[2].mxu0  ;;  %v272_v0 = vmul.f32 %v266_v28, %v249_v26 }
 0x133   :  { %v276_v32 = vmul.f32 %v270_v27, %v172_v20  ;;  %v267_v33 = vmul.f32 0.044715, %v178_v31  ;;  %v180_v34 = vpop.f32.mrb[3].mxu0  ;;  %v281_v35 = vmul.f32 %v638_v22, %v275_v29  ;;  %v261_v14 = vmul.f32 0.5, %v178_v31 }
 0x134   :  { %v277_v36 = vmul.f32 %v271_v30, %v174_v23  ;;  %v268_v37 = vmul.f32 0.044715, %v180_v34  ;;  %v278_v39 = vmul.f32 %v272_v0, %v249_v26  ;;  %v262_v7 = vmul.f32 0.5, %v180_v34 }
 0x135   :  { %v282_v38 = vadd.f32 %v276_v32, %v172_v20  ;;  %v273_v40 = vmul.f32 %v267_v33, %v178_v31  ;;  %v287_v41 = vadd.f32 %v638_v22, %v281_v35 }
 0x136   :  { %v283_v42 = vadd.f32 %v277_v36, %v174_v23  ;;  %v274_v43 = vmul.f32 %v268_v37, %v180_v34  ;;  %v284_v45 = vadd.f32 %v278_v39, %v249_v26 }
 0x137   :  { %v288_v44 = vmul.f32 0.7978846, %v282_v38  ;;  %v279_v46 = vmul.f32 %v273_v40, %v178_v31  ;;  %v293_v47 = vmul.f32 0.7978846, %v287_v41 }
 0x138   :  { %v289_v48 = vmul.f32 0.7978846, %v283_v42  ;;  %v280_v49 = vmul.f32 %v274_v43, %v180_v34  ;;  %v290_v50 = vmul.f32 0.7978846, %v284_v45 }
 0x139   :  { %811 = vtanh.f32 %v288_v44  ;;  %v285_v51 = vadd.f32 %v279_v46, %v178_v31 }
 0x13a   :  { %813 = vtanh.f32 %v293_v47  ;;  %v286_v52 = vadd.f32 %v280_v49, %v180_v34 }
 0x13b   :  { %v291_v53 = vmul.f32 0.7978846, %v285_v51  ;;  %815 = vtanh.f32 %v289_v48 }
 0x13c   :  { %v292_v54 = vmul.f32 0.7978846, %v286_v52  ;;  %817 = vtanh.f32 %v290_v50 }
 0x13d   :  { %819 = vtanh.f32 %v291_v53 }
 0x13e   :  { %821 = vtanh.f32 %v292_v54 }
 0x143   :  { %v812_v55 = vpop.eup %811 }
 0x144   :  { %v814_v56 = vpop.eup %813  ;;  %v300_v58 = vadd.f32 1.0, %v812_v55 }
 0x145   :  { %v816_v57 = vpop.eup %815  ;;  %v305_v62 = vadd.f32 1.0, %v814_v56 }
 0x146   :  { %v818_v59 = vpop.eup %817  ;;  %v301_v61 = vadd.f32 1.0, %v816_v57  ;;  %v306_v8 = vmul.f32 %v300_v58, %v258_v1 }
 0x147   :  { %v820_v63 = vpop.eup %819  ;;  %v302_v3 = vadd.f32 1.0, %v818_v59  ;;  %v311_v12 = vmul.f32 %v305_v62, %v263_v5 }
 0x148   :  { %v822_v4 = vpop.eup %821  ;;  %v307_v6 = vmul.f32 %v301_v61, %v259_v60  ;;  %v303_v11 = vadd.f32 1.0, %v820_v63 }
 0x149   :  { %v308_v9 = vmul.f32 %v302_v3, %v260_v2  ;;  %v304_v10 = vadd.f32 1.0, %v822_v4 }
 0x14a   :  { %424 = vmatprep.mubr.f32.mxu0 %v307_v6  ;;  %v309_v15 = vmul.f32 %v303_v11, %v261_v14 }
 0x14b   :  { %671 = vmatprep.mubr.f32.mxu1 %v308_v9  ;;  %425 = vmatmul.mubr.f32.vlgmr.msra.gmra.mrb[4].mxu0 %v306_v8  ;;  %v310_v13 = vmul.f32 %v304_v10, %v262_v7 }
 0x14c   :  { %672 = vmatmul.mubr.f32.vlgmr.msra.gmra.mrb[2].mxu1 %v311_v12 }
 0x14d   :  { %429 = vmatprep.mubr.f32.mxu0 %v310_v13 }
 0x14f   :  { %430 = vmatmul.mubr.f32.gmra.mrb[6].mxu0 %v309_v15 }
 0x21e   :  { %v580_v16 = vpop.f32.mrb[4].mxu0 }
 0x21f   :  { %v673_v17 = vpop.f32.mrb[2].mxu1  ;;  %v581_v18 = vpop.f32.mrb[5].mxu0 }
 0x220   :  { %v582_v19 = vadd.f32 %v581_v18, %v580_v16  ;;  %v501_v20 = vpop.f32.mrb[3].mxu1 }
 0x222   :  { %v502_v21 = vadd.f32 %v582_v19, %v501_v20  ;;  %v583_v22 = vpop.f32.mrb[6].mxu0 }
 0x223   :  { %v584_v23 = vpop.f32.mrb[7].mxu0 }
 0x224   :  { %510 = vst [vmem:[#allocation8] sm:$0xff] %v502_v21  ;;  %v585_v24 = vadd.f32 %v584_v23, %v583_v22 }
 0x226   :  { %v507_v25 = vadd.f32 %v673_v17, %v585_v24 }
 0x228   :  { %511 = vst [vmem:[#allocation8 + $0x8] sm:$0xff] %v507_v25 }
 0x229   :  { %900 = shalt.err (!%p897_p0)
}
 0x22a   :  { %s901_s27 = scalar_lea.hbm %s1008_s3, 256 }
 0x22b   :  { %p902_p1 = scmp.ne.s32.totalorder %s1008_s3, %s901_s27  ;;  %p905_p2 = scmp.lt.u32.totalorder %s901_s27, %s1008_s3 }
 0x22d   :  { %p907_p3 = pnand %p905_p2, %p902_p1 }
 0x22f   :  { %910 = shalt.err (!%p907_p3)
}
 0x230   :  { %523 = dma.vmem_to_hbm [thread:$0]  %s518_s23, 256, %s1008_s3, [#allocation4], %s921_s1, %s921_s1, %s922_s9  }
 0x231   :  { %915 = dma.done.wait [#allocation4], 256  }
 0x232   :  { %916 = vsyncadd [#allocation4], 4294967040 }
 0x233   :  { %527 = vsyncpa [#allocation3], 1 }
 0x234   :  { %528 = vsyncpa [#allocation6], 1 }
 0x235   :  { %529 = vsyncpa [#allocation4], 1 }

</bundles_post_ra>
